<compile_context>
chip_gen: v7x
topology: tpu7x:2x2x1
jax: 0.10.0
libtpu: 0.0.40
codegen_flags: <defaults>
</compile_context>

<pallas_src>
import functools

import jax
import jax.numpy as jnp
from jax.experimental import pallas as pl
from jax.experimental.pallas import tpu as pltpu

EPS = 1e-5


@functools.lru_cache(maxsize=1)
def _roll_matches_jnp_convention() -> bool:
    """Probe pltpu.roll's shift convention once (expected: jnp.roll semantics).

    The 3x3 im2col builds its taps with pltpu.roll + border masks; a flipped
    rotate convention would silently pair taps with the wrong weight slab, so
    we pin the sign with a 1-block probe kernel.
    """
    n = 16

    def probe(x_ref, o_ref):
        o_ref[...] = pltpu.roll(x_ref[...], 1, 1)

    x = jnp.arange(n * 128, dtype=jnp.float32).reshape(1, n, 128)
    out = pl.pallas_call(
        probe, out_shape=jax.ShapeDtypeStruct((1, n, 128), jnp.float32))(x)
    # jnp.roll convention: out[0, 0, :] == x[0, n-1, :]  (== (n-1)*128 at lane 0).
    return bool(out[0, 0, 0] == float((n - 1) * 128))


def _group_norm(t, gamma, beta, num_groups):
    """GroupNorm over t of shape (B, R, C) with per-sample statistics (f32).

    Two-pass (centered) variance.  Group-fold matmuls are skipped entirely when
    channels_per_group == 1 and the affine is fused into a single scale so
    normalization costs two full-size VPU passes (EUP rsqrt is free).
    """
    Bb, R, C = t.shape
    cg = C // num_groups
    inv_cnt = 1.0 / float(R * cg)

    s1 = jnp.sum(t, axis=1)                                      # (B, C)
    if cg == 1:
        mean_c = s1 * inv_cnt
        fold = spread = None
    else:
        ci = jax.lax.broadcasted_iota(jnp.int32, (C, num_groups), 0)
        gi = jax.lax.broadcasted_iota(jnp.int32, (C, num_groups), 1)
        fold = ((ci // cg) == gi).astype(jnp.float32)            # (C, G)
        gi2 = jax.lax.broadcasted_iota(jnp.int32, (num_groups, C), 0)
        ci2 = jax.lax.broadcasted_iota(jnp.int32, (num_groups, C), 1)
        spread = ((ci2 // cg) == gi2).astype(jnp.float32)        # (G, C)
        mean_g = jnp.dot(s1, fold, preferred_element_type=jnp.float32) * inv_cnt
        mean_c = jnp.dot(mean_g, spread, preferred_element_type=jnp.float32)

    centered = t - mean_c.reshape(Bb, 1, C)                      # full pass 1
    s2 = jnp.sum(centered * centered, axis=1)                    # (B, C)
    if cg == 1:
        var_c = s2 * inv_cnt
    else:
        var_g = jnp.dot(s2, fold, preferred_element_type=jnp.float32) * inv_cnt
        var_c = jnp.dot(var_g, spread, preferred_element_type=jnp.float32)

    # Fused affine on the tiny (B,1,C) stats, then one mul + one add full-size.
    scale = jax.lax.rsqrt(var_c + EPS).reshape(Bb, 1, C) * gamma.reshape(1, 1, C)
    return centered * scale + beta.reshape(1, 1, C)              # full pass 2


def bottleneck_kernel(x_ref, w1_ref, g1_ref, b1_ref,
                      w2_ref, g2_ref, b2_ref,
                      w3_ref, g3_ref, b3_ref,
                      out_ref, *, H, W, num_groups, roll_matches_jnp):
    Bb = x_ref.shape[0]
    Cin = x_ref.shape[-1]
    width = w1_ref.shape[-1]
    Cout = w3_ref.shape[-1]
    HW = H * W
    M = Bb * HW

    # Activations stay bf16; only GN stats / matmul accumulators are f32.
    x_bf = x_ref[...].reshape(Bb, HW, Cin)             # bf16, reused by residual

    # ---- conv1 (1x1) + GN + ReLU --------------------------------------------
    t1 = jnp.dot(x_bf.reshape(M, Cin), w1_ref[...],
                 preferred_element_type=jnp.float32)   # (M, width) f32
    t1 = _group_norm(t1.reshape(Bb, HW, width), g1_ref[...], b1_ref[...],
                     num_groups)
    t1b = jnp.maximum(t1, 0.0).astype(jnp.bfloat16)    # single bf16 cast

    # ---- conv2 (3x3, stride=1, pad=1): roll-based im2col, single matmul ------
    # tap(dy,dx)[p] = t1[p + dy*W + dx] with zero borders (SAME padding).
    # Shifts = XLU rotations over the flattened per-sample HW (sublane) axis;
    # borders are re-zeroed with a (1, HW, 1) validity mask, so there are no
    # zero-block concatenations and no per-tap casts.
    pos = jax.lax.broadcasted_iota(jnp.int32, (1, HW, 1), 1)
    hh = pos // W
    ww = pos - hh * W
    zero = jnp.zeros((), jnp.bfloat16)
    taps = []
    for dy in (-1, 0, 1):                              # ky-major: matches HWIO
        for dx in (-1, 0, 1):
            k = dy * W + dx
            if k == 0:
                taps.append(t1b)
                continue
            shift = (-k) % HW if roll_matches_jnp else k % HW
            shifted = pltpu.roll(t1b, shift, 1)
            valid = ((hh + dy >= 0) & (hh + dy < H) &
                     (ww + dx >= 0) & (ww + dx < W))
            taps.append(jnp.where(valid, shifted, zero))
    col = jnp.concatenate(taps, axis=-1).reshape(M, 9 * width)   # bf16
    t2 = jnp.dot(col, w2_ref[...], preferred_element_type=jnp.float32)
    t2 = _group_norm(t2.reshape(Bb, HW, width), g2_ref[...], b2_ref[...],
                     num_groups)
    t2b = jnp.maximum(t2, 0.0).astype(jnp.bfloat16)

    # ---- conv3 (1x1) + GN -----------------------------------------------------
    t3 = jnp.dot(t2b.reshape(M, width), w3_ref[...],
                 preferred_element_type=jnp.float32)   # (M, Cout) f32
    t3 = _group_norm(t3.reshape(Bb, HW, Cout), g3_ref[...], b3_ref[...],
                     num_groups)

    # ---- residual add (f32 accumulate over bf16 identity) + ReLU --------------
    y = jnp.maximum(t3 + x_bf.astype(jnp.float32), 0.0)
    out_ref[...] = y.reshape(Bb, H, W, Cout).astype(out_ref.dtype)


def _vmem_capacity_bytes() -> int:
    try:
        cap = getattr(pltpu.get_tpu_info(), "vmem_capacity_bytes", None)
        if cap:
            return int(cap)
    except Exception:
        pass
    return 64 * 1024 * 1024   # conservative default (v7x physical VMEM)


def _pick_batch_block(N, H, W, Cin, width, Cout, budget_bytes, out_bytes):
    """Largest divisor of N whose per-step working set fits the VMEM budget,
    while keeping >= 2 grid steps so the 'parallel' batch axis can shard across
    v7x's two TensorCores (and the pipeline has steps to overlap)."""
    HW = H * W
    weight_bytes = 2 * 2 * (Cin * width + 9 * width * width + width * Cout)
    per_sample = HW * (
        2 * 2 * Cin              # bf16 input block (double-buffered)
        + 2 * out_bytes * Cout   # output block (double-buffered)
        + 4 * Cin                # f32 identity copy at the residual add
        + 2 * 4 * width          # t1 / t2 f32
        + 4 * width              # GN centered temporary
        + 2 * width              # bf16 copy of t1
        + 2 * 18 * width         # 9 bf16 taps + bf16 im2col operand
        + 2 * 4 * Cout           # t3 f32 + GN centered
    )
    best = 1
    for b in range(1, min(N, 16) + 1):
        if N % b == 0 and weight_bytes + b * per_sample <= budget_bytes:
            best = b
    if best == N and N > 1:
        for b in range(best // 2, 0, -1):
            if N % b == 0:
                best = b
                break
    return best
    # TODO(synk): if even batch_block=1 exceeds the budget (56x56 stages on
    # v7x), restructure GroupNorm into a two-pass stats/normalize form so H can
    # become a grid axis.


def bottleneck_forward(x_nhwc, params, *, num_groups=32, batch_block=None,
                       out_dtype=jnp.bfloat16):
    N, H, W, Cin = x_nhwc.shape
    w1, g1, b1, w2, g2, b2, w3, g3, b3 = params
    width = w1.shape[1]
    Cout = w3.shape[1]
    # Identity residual path requires matching channel counts (downsample=None).
    assert Cin == Cout, "identity residual requires inplanes == planes * expansion"
    assert width % num_groups == 0 and Cout % num_groups == 0

    out_bytes = jnp.dtype(out_dtype).itemsize
    vmem_cap = _vmem_capacity_bytes()
    # ~48 MiB on v7x (64 MiB physical), ~96 MiB on v5e/v6e (128 MiB physical).
    vmem_limit = max(32 * 1024 * 1024, min(vmem_cap * 3 // 4, 112 * 1024 * 1024))

    if batch_block is None:
        batch_block = _pick_batch_block(N, H, W, Cin, width, Cout,
                                        vmem_limit, out_bytes)
    assert N % batch_block == 0
    Bb = batch_block

    # bf16 activations / weights (halves HBM traffic + block VMEM); all matmuls
    # accumulate in f32 inside the kernel.
    x_b = x_nhwc.astype(jnp.bfloat16)
    w1_p = w1.astype(jnp.bfloat16)                               # (Cin, width)
    w2_p = w2.reshape(9 * width, width).astype(jnp.bfloat16)     # (ky*kx*ci, co)
    w3_p = w3.astype(jnp.bfloat16)                               # (width, Cout)
    # TODO(synk): lane-pad width<128 stages to 128 MXU output columns and
    # single-buffer the invariant weight blocks (pipeline_mode=pl.Buffered(1)).

    flops = 2 * N * H * W * (Cin * width + 9 * width * width + width * Cout)
    bytes_accessed = (x_b.size * 2 + N * H * W * Cout * out_bytes
                      + 2 * (Cin * width + 9 * width * width + width * Cout)
                      + 4 * 2 * (width + width + Cout))
    cost = pl.CostEstimate(flops=int(flops),
                           transcendentals=int(N * (2 * width + Cout)),
                           bytes_accessed=int(bytes_accessed))

    kernel = functools.partial(
        bottleneck_kernel, H=H, W=W, num_groups=num_groups,
        roll_matches_jnp=_roll_matches_jnp_convention())

    return pl.pallas_call(
        kernel,
        out_shape=jax.ShapeDtypeStruct((N, H, W, Cout), out_dtype),
        grid_spec=pltpu.PrefetchScalarGridSpec(
            num_scalar_prefetch=0,
            grid=(N // Bb,),
            in_specs=[
                pl.BlockSpec((Bb, H, W, Cin), lambda n: (n, 0, 0, 0)),
                pl.BlockSpec((Cin, width), lambda n: (0, 0)),
                pl.BlockSpec((1, width), lambda n: (0, 0)),
                pl.BlockSpec((1, width), lambda n: (0, 0)),
                pl.BlockSpec((9 * width, width), lambda n: (0, 0)),
                pl.BlockSpec((1, width), lambda n: (0, 0)),
                pl.BlockSpec((1, width), lambda n: (0, 0)),
                pl.BlockSpec((width, Cout), lambda n: (0, 0)),
                pl.BlockSpec((1, Cout), lambda n: (0, 0)),
                pl.BlockSpec((1, Cout), lambda n: (0, 0)),
            ],
            out_specs=pl.BlockSpec((Bb, H, W, Cout), lambda n: (n, 0, 0, 0)),
        ),
        compiler_params=pltpu.CompilerParams(
            dimension_semantics=("parallel",),       # batch blocks independent
            vmem_limit_bytes=int(vmem_limit),
        ),
        cost_estimate=cost,
    )(x_b, w1_p, g1, b1, w2_p, g2, b2, w3_p, g3, b3)


# ----------------------------- pure-JAX reference -----------------------------
def _gn_ref(x, gamma, beta, G):
    N, H, W, C = x.shape
    xg = x.reshape(N, H, W, G, C // G)
    mean = xg.mean(axis=(1, 2, 4), keepdims=True)
    var = xg.var(axis=(1, 2, 4), keepdims=True)
    xn = ((xg - mean) / jnp.sqrt(var + EPS)).reshape(N, H, W, C)
    return xn * gamma.reshape(1, 1, 1, C) + beta.reshape(1, 1, 1, C)


def bottleneck_ref(x, params, G=32):
    w1, g1, b1, w2, g2, b2, w3, g3, b3 = params
    t = jnp.einsum('nhwc,cd->nhwd', x, w1)
    t = jax.nn.relu(_gn_ref(t, g1, b1, G))
    t = jax.lax.conv_general_dilated(
        t, w2, window_strides=(1, 1), padding='SAME',
        dimension_numbers=('NHWC', 'HWIO', 'NHWC'))
    t = jax.nn.relu(_gn_ref(t, g2, b2, G))
    t = jnp.einsum('nhwc,cd->nhwd', t, w3)
    t = _gn_ref(t, g3, b3, G)
    return jax.nn.relu(t + x)


# ----------------------------------- main -----------------------------------
if __name__ == "__main__":
    # Small but GroupNorm(32)-compatible shapes:
    # planes=32 -> width=32, expansion*planes=128 -> inplanes must be 128 (identity path).
    N, H, W = 2, 8, 8
    planes = 32
    width = planes              # base_width=64, groups=1
    inplanes = planes * 4       # = 128 (== Cout, residual compatible)
    Cout = planes * 4
    G = 32

    key = jax.random.PRNGKey(0)
    ks = jax.random.split(key, 10)

    # x in PyTorch NCHW, then converted to the kernel's NHWC layout.
    x_nchw = jax.random.normal(ks[0], (N, inplanes, H, W), jnp.float32)
    x_nhwc = jnp.transpose(x_nchw, (0, 2, 3, 1))

    def conv_scale(fan_in):
        return 1.0 / jnp.sqrt(fan_in)

    # conv1: torch (width, inplanes, 1, 1) -> (inplanes, width)
    w1 = jax.random.normal(ks[1], (inplanes, width), jnp.float32) * conv_scale(inplanes)
    # conv2: torch (width, width, 3, 3) -> HWIO (3, 3, width, width)
    w2 = jax.random.normal(ks[2], (3, 3, width, width), jnp.float32) * conv_scale(width * 9)
    # conv3: torch (Cout, width, 1, 1) -> (width, Cout)
    w3 = jax.random.normal(ks[3], (width, Cout), jnp.float32) * conv_scale(width)

    # GroupNorm affine params (non-trivial so the affine path is exercised).
    g1 = (1.0 + 0.1 * jax.random.normal(ks[4], (1, width))).astype(jnp.float32)
    b1 = (0.1 * jax.random.normal(ks[5], (1, width))).astype(jnp.float32)
    g2 = (1.0 + 0.1 * jax.random.normal(ks[6], (1, width))).astype(jnp.float32)
    b2 = (0.1 * jax.random.normal(ks[7], (1, width))).astype(jnp.float32)
    g3 = (1.0 + 0.1 * jax.random.normal(ks[8], (1, Cout))).astype(jnp.float32)
    b3 = (0.1 * jax.random.normal(ks[9], (1, Cout))).astype(jnp.float32)

    params = (w1, g1, b1, w2, g2, b2, w3, g3, b3)

    out = bottleneck_forward(x_nhwc, params, num_groups=G)
    out = jax.block_until_ready(out)

    # Reference fed the same bf16-quantized identity the kernel sees.
    x_q = x_nhwc.astype(jnp.bfloat16).astype(jnp.float32)
    ref = jax.block_until_ready(bottleneck_ref(x_q, params, G=G))
    assert out.shape == (N, H, W, Cout)
    out_f32 = out.astype(jnp.float32)
    max_diff = float(jnp.max(jnp.abs(out_f32 - ref)))
    # Kernel uses bf16 activations / MXU operands (f32 accumulation) across
    # three chained conv+GN stages; match the f32 reference at bf16 tolerance.
    assert bool(jnp.allclose(out_f32, ref, atol=1e-1, rtol=1e-1)), (
        f"max abs diff {max_diff}")

    print("KERNEL_OK")
</pallas_src>

<mosaic_0001>
module attributes {stable_mosaic.version = 11 : i64} {
  func.func @probe(%arg0: memref<1x16x128xf32, #tpu.memory_space<vmem>>, %arg1: memref<1x16x128xf32, #tpu.memory_space<vmem>>) attributes {dimension_semantics = [], scalar_prefetch = 0 : i64, scratch_operands = 0 : i64, tpu.core_type = #tpu.core_type<tc>} {
    %c0 = arith.constant 0 : index
    %c0_0 = arith.constant 0 : index
    %c0_1 = arith.constant 0 : index
    %0 = vector.load %arg0[%c0, %c0_0, %c0_1] : memref<1x16x128xf32, #tpu.memory_space<vmem>>, vector<1x16x128xf32>
    %c1_i32 = arith.constant 1 : i32
    %1 = tpu.dynamic_rotate %0 by %c1_i32 dim 1 : vector<1x16x128xf32>, i32 -> vector<1x16x128xf32>
    %c0_2 = arith.constant 0 : index
    %c0_3 = arith.constant 0 : index
    %c0_4 = arith.constant 0 : index
    %2 = vector.load %arg1[%c0_2, %c0_3, %c0_4] : memref<1x16x128xf32, #tpu.memory_space<vmem>>, vector<1x16x128xf32>
    tpu.vector_store %arg1[%c0_2, %c0_3, %c0_4], %1 {strides = array<i32>} : memref<1x16x128xf32, #tpu.memory_space<vmem>>, vector<1x16x128xf32>,
    return
  }
}

</mosaic_0001>

<bundles_post_ra>
// kernel: tpu_custom_call.1
= control target key start
LH: loop header
LB: loop body
LE: loop exit
PB: predicated region body
PF: predicated region fallthrough
CT: control target
= control target key end

     0   :  { %6 = vsyncpa [#allocation3], 0  ;;  %s147_s0 = inlined_call_operand.hbm [shape: f32[1,16,128], index: 0, kind: input, shape index: {}]   ;;  %s148_s1 = inlined_call_operand.hbm [shape: f32[1,16,128], index: 1, kind: output, shape index: {}]  }
   0x1   :  { %7 = vsyncpa [#allocation4], 0  ;;  %s103_s6 = smov [#allocation2]   ;;  %s55_s10 = scalar_lea.hbm %s147_s0, 256 }
   0x2   :  { %s13_s7 = sshll.u32 %s103_s6, 4  ;;  %p56_p0 = scmp.ne.s32.totalorder %s147_s0, %s55_s10  ;;  %s14_s7 = int_to_ptr.vmem [resolvable:$true] %s13_s7 }
   0x3   :  { %p59_p1 = scmp.lt.u32.totalorder %s55_s10, %s147_s0 }
   0x5   :  { %p61_p2 = pnand %p59_p1, %p56_p0 }
   0x7   :  { %64 = shalt.err (!%p61_p2)
}
   0x8   :  { %s65_s15 = scalar_lea.vmem %s14_s7, 256  ;;  %p70_p4 = scmp.lt.s32.totalorder %s14_s7, %s14_s7 }
   0x9   :  { %p66_p3 = scmp.ne.s32.totalorder %s14_s7, %s65_s15  ;;  %p71_p5 = scmp.lt.s32.totalorder %s65_s15, %s65_s15 }
   0xb   :  { %p72_p6 = por %p71_p5, %p70_p4 }
   0xd   :  { %p73_p7 = pnand %p72_p6, %p66_p3 }
   0xf   :  { %76 = shalt.err (!%p73_p7)
}
  0x10   :  { %s104_s16 = smov 128   ;;  %s105_s17 = smov 8  }
  0x11   :  { %19 = dma.hbm_to_vmem [thread:$0]  %s147_s0, 256, %s14_s7, [#allocation3], %s104_s16, %s104_s16, %s105_s17  }
  0x12   :  { %99 = dma.done.wait [#allocation3], 256  }
  0x13   :  { %100 = vsyncadd [#allocation3], 4294967040  ;;  %v27_v0 = vlaneseq  ;;  %s106_s20 = smov [#allocation5]   ;;  %v23_v2 = vld [vmem:[#allocation2] sm:$0xff]  ;;  %v24_v3 = vld [vmem:[#allocation2 + $0x8] sm:$0xff] }
  0x14   :  { %s39_s21 = sshll.u32 %s106_s20, 4  ;;  %v25_v4 = vrot.slane %v23_v2, 7  ;;  %v26_v5 = vrot.slane %v24_v3, 7  ;;  %s40_s21 = int_to_ptr.vmem [resolvable:$true] %s39_s21 }
  0x15   :  { %v28_v1 = vshrl.u32 %v27_v0, 7  ;;  %s77_s22 = scalar_lea.vmem %s40_s21, 256  ;;  %p82_p9 = scmp.lt.s32.totalorder %s40_s21, %s40_s21 }
  0x16   :  { %p78_p8 = scmp.ne.s32.totalorder %s40_s21, %s77_s22  ;;  %p83_p10 = scmp.lt.s32.totalorder %s77_s22, %s77_s22 }
  0x17   :  { %vm29_vm0 = vcmp.lt.s32.totalorder %v28_v1, 1 }
  0x18   :  { %v31_v6 = vsel %vm29_vm0, %v26_v5, %v25_v4  ;;  %v30_v7 = vsel %vm29_vm0, %v25_v4, %v26_v5  ;;  %p84_p11 = por %p83_p10, %p82_p9 }
  0x19   :  { %32 = vst [vmem:[#allocation5] sm:$0xff] %v31_v6  ;;  %33 = vst [vmem:[#allocation5 + $0x8] sm:$0xff] %v30_v7 }
  0x1a   :  { %p85_p12 = pnand %p84_p11, %p78_p8 }
  0x1c   :  { %88 = shalt.err (!%p85_p12)
}
  0x1d   :  { %s89_s24 = scalar_lea.hbm %s148_s1, 256 }
  0x1e   :  { %p90_p13 = scmp.ne.s32.totalorder %s148_s1, %s89_s24  ;;  %p93_p0 = scmp.lt.u32.totalorder %s89_s24, %s148_s1 }
  0x20   :  { %p95_p1 = pnand %p93_p0, %p90_p13 }
  0x22   :  { %98 = shalt.err (!%p95_p1)
}
  0x23   :  { %45 = dma.vmem_to_hbm [thread:$0]  %s40_s21, 256, %s148_s1, [#allocation4], %s104_s16, %s104_s16, %s105_s17  }
  0x24   :  { %101 = dma.done.wait [#allocation4], 256  }
  0x25   :  { %102 = vsyncadd [#allocation4], 4294967040 }
  0x26   :  { %49 = vsyncpa [#allocation3], 1 }
  0x27   :  { %50 = vsyncpa [#allocation4], 1 }

</bundles_post_ra>
